<compile_context>
chip_gen: v5e
topology: v5e:2x2
jax: 0.10.0
libtpu: 0.0.40
codegen_flags: <defaults>
</compile_context>

<pallas_src>
import functools

import jax
import jax.numpy as jnp
from jax import lax
from jax.experimental import pallas as pl
from jax.experimental.pallas import tpu as pltpu

_LANE = 128      # last-dim tile (lanes)
_SUBLANE = 8     # second-to-last-dim tile (sublanes, f32)


def _round_up(n, m):
    return (n + m - 1) // m * m


def _vmem_budget_bytes():
    """~80% of the physical per-core VMEM (v5e/v6e ~102 MiB, v7x ~51 MiB)."""
    try:
        cap = int(pltpu.get_tpu_info().vmem_capacity_bytes)
    except Exception:
        cap = 64 << 20          # conservative fallback (v7x physical size)
    return max(16 << 20, int(cap * 0.8))


@functools.lru_cache(maxsize=None)
def _single_buffered_specs_supported():
    """True iff pl.Buffered(1) on a constant-index BlockSpec compiles cleanly."""
    try:
        def k(x_ref, o_ref):
            o_ref[...] = x_ref[...]

        f = pl.pallas_call(
            k,
            out_shape=jax.ShapeDtypeStruct((16, 128), jnp.float32),
            grid=(2,),
            in_specs=[pl.BlockSpec((8, 128), lambda i: (0, 0),
                                   pipeline_mode=pl.Buffered(1))],
            out_specs=pl.BlockSpec((8, 128), lambda i: (i, 0)),
        )
        jax.jit(f).lower(jax.ShapeDtypeStruct((8, 128), jnp.float32)).compile()
        return True
    except Exception:
        return False


def _choose_batch_tile(Bp, cap, q):
    """Largest multiple of q that is <= cap and exactly divides Bp (Bp % q == 0)."""
    cap = max(q, min(cap, Bp))
    k = Bp // q
    for d in range(cap // q, 0, -1):
        if k % d == 0:
            return d * q
    return q


def _make_kernel(num_steps, use_bf16_matmul, n_sub):
    """Kernel body; num_steps / use_bf16_matmul / n_sub are trace-time consts."""
    mm_dtype = jnp.bfloat16 if use_bf16_matmul else jnp.float32

    def kernel(x_ref, w_ref, b_ref, o_ref):
        # x_ref : [tm, Wp]  activation tile (streamed over batch, input dtype)
        # w_ref : [Wp, Wp]  weight, pre-transposed to [in, out] (VMEM-resident)
        # b_ref : [1,  Wp]  f32 bias (VMEM-resident)
        tm, Wp = x_ref.shape
        sub = tm // n_sub
        w = w_ref[...]
        # Hoisted bias broadcast (JAX does not CSE broadcast_in_dim in the loop).
        b = jnp.broadcast_to(b_ref[...].astype(jnp.float32), (sub, Wp))

        def one_chunk(h_f32):
            acc = jnp.dot(h_f32.astype(mm_dtype), w,
                          preferred_element_type=jnp.float32)
            # Bias add + tanh stay f32 (v5e VPU/EUP have no bf16 path).
            return jnp.tanh(acc + b)

        if num_steps == 1:
            o_ref[...] = one_chunk(x_ref[...].astype(jnp.float32)).astype(o_ref.dtype)
        else:
            # Fused ODE trajectory: W/b loaded once, activations stay resident.
            # Independent row chunks let chunk i+1's matmul overlap chunk i's tanh.
            chunks = tuple(
                x_ref[ci * sub:(ci + 1) * sub, :].astype(jnp.float32)
                for ci in range(n_sub))
            chunks = lax.fori_loop(
                0, num_steps,
                lambda _, hs: tuple(one_chunk(h) for h in hs),
                chunks, unroll=(num_steps <= 8))
            for ci in range(n_sub):
                o_ref[ci * sub:(ci + 1) * sub, :] = chunks[ci].astype(o_ref.dtype)

    return kernel


def make_step_layer(weight, bias, *, num_steps=1, batch_tile=512,
                    use_bf16_matmul=None):
    """One-time parameter prep (transpose + lane-dense padding, done OUTSIDE the
    hot path); returns a jitted apply(x) callable.

    apply(x): x [B, width] -> [B, width] = tanh(x @ W.T + b), applied
    `num_steps` times (num_steps=1 == the PyTorch module forward).
    """
    W_out, W_in = weight.shape
    assert W_out == W_in, "StepLayer uses a square Linear (width -> width)"
    width = W_out
    Wp = _round_up(width, _LANE)

    if use_bf16_matmul is None:
        # Small widths are DMA/EUP-bound -> keep f32; wide layers win on the MXU.
        use_bf16_matmul = width >= 256
    w_dtype = jnp.bfloat16 if use_bf16_matmul else jnp.float32

    # Pre-transpose to [in, out] = (K, N) layout and zero-pad ONCE at init time.
    # Zero padding keeps the math exact: padded output features are tanh(0+0)=0
    # and padded input features contract against zero weight rows.
    w_p = jnp.zeros((Wp, Wp), w_dtype).at[:width, :width].set(
        weight.T.astype(w_dtype))
    b_p = jnp.zeros((1, Wp), jnp.float32).at[0, :width].set(
        bias.astype(jnp.float32))

    single_buffered = _single_buffered_specs_supported()
    resident_kwargs = dict(pipeline_mode=pl.Buffered(1)) if single_buffered else {}
    # Weight / bias: constant index_map -> VMEM-resident across the batch grid.
    w_spec = pl.BlockSpec((Wp, Wp), lambda i: (0, 0), **resident_kwargs)
    b_spec = pl.BlockSpec((1, Wp), lambda i: (0, 0), **resident_kwargs)

    vmem_budget = _vmem_budget_bytes()
    # TODO(synk): add a K/N-tiled fallback (grid over out-features "parallel" +
    # contraction "arbitrary" with an f32 VMEM accumulator) once Wp*Wp*itemsize
    # approaches the VMEM budget; the fused num_steps>1 path needs W fully
    # resident, so gate it off in that regime.

    @jax.jit
    def apply(x):
        B, Wx = x.shape
        assert Wx == width
        out_dtype = x.dtype
        itemsize = jnp.dtype(x.dtype).itemsize
        # Sublane quantum for this dtype (f32: 8, bf16: 16, int8/fp8: 32).
        q = max(_SUBLANE, 32 // itemsize)

        # Pad the batch only to the sublane quantum; pick a tile that divides it
        # exactly (no round-up-to-tile waste).
        Bp = _round_up(B, q)
        tm = _choose_batch_tile(Bp, batch_tile, q)
        if tm < 64 and Bp >= 512:
            # Poorly factorable large batch: accept a bounded pad (< 256 rows)
            # instead of a tiny tile / very long grid.
            tm = max(q, (min(batch_tile, 256) // q) * q)
            Bp = _round_up(Bp, tm)
        # Keep >= 2 grid steps when possible so both v7x TensorCores get work.
        if Bp // tm < 2 and Bp >= 2 * q:
            tm = _choose_batch_tile(Bp, Bp // 2, q)

        n_sub = 1
        if num_steps > 1:
            if tm % (4 * q) == 0 and tm >= 4 * q:
                n_sub = 4
            elif tm % (2 * q) == 0:
                n_sub = 2

        # Pad in the input's OWN dtype (no wrapper-side f32 up-cast pass).
        if (Bp, Wp) != (B, Wx):
            x_p = jnp.zeros((Bp, Wp), x.dtype).at[:B, :width].set(x)
        else:
            x_p = x

        grid = (Bp // tm,)

        w_bufs = 1 if single_buffered else 2
        vmem_bytes = (2 * tm * Wp * itemsize              # x tiles (double-buffered)
                      + 2 * tm * Wp * itemsize            # out tiles
                      + w_bufs * (Wp * Wp * w_p.dtype.itemsize + Wp * 4)
                      + 4 * tm * Wp * 4)                  # f32 working-set headroom
        vmem_limit = int(min(max(2 * vmem_bytes, 4 << 20), vmem_budget))

        cost = pl.CostEstimate(
            flops=2 * Bp * Wp * Wp * num_steps,
            transcendentals=Bp * Wp * num_steps,
            bytes_accessed=(2 * Bp * Wp * itemsize
                            + Wp * Wp * w_p.dtype.itemsize + Wp * 4),
        )

        kernel = _make_kernel(num_steps, use_bf16_matmul, n_sub)

        out_p = pl.pallas_call(
            kernel,
            out_shape=jax.ShapeDtypeStruct((Bp, Wp), out_dtype),
            grid_spec=pltpu.PrefetchScalarGridSpec(
                num_scalar_prefetch=0,
                grid=grid,
                in_specs=[
                    # Activation tile streams over the batch grid axis.
                    pl.BlockSpec((tm, Wp), lambda i: (i, 0)),
                    w_spec,
                    b_spec,
                ],
                out_specs=pl.BlockSpec((tm, Wp), lambda i: (i, 0)),
            ),
            compiler_params=pltpu.CompilerParams(
                dimension_semantics=("parallel",),   # shards across v7x's 2 TCs
                vmem_limit_bytes=vmem_limit,
            ),
            cost_estimate=cost,
        )(x_p, w_p, b_p)

        return out_p[:B, :width].astype(out_dtype)

    return apply


if __name__ == "__main__":
    key = jax.random.PRNGKey(0)
    k_x, k_w, k_b = jax.random.split(key, 3)

    batch, width = 8, 32

    x = jax.random.normal(k_x, (batch, width), dtype=jnp.float32)
    # PyTorch-style Linear params: W [out, in], b [out].
    bound = 1.0 / (width ** 0.5)
    weight = jax.random.uniform(k_w, (width, width), dtype=jnp.float32,
                                minval=-bound, maxval=bound)
    bias = jax.random.uniform(k_b, (width,), dtype=jnp.float32,
                              minval=-bound, maxval=bound)

    # --- Single step: exactly the module forward. ---
    step = make_step_layer(weight, bias)
    out = jax.block_until_ready(step(x))
    ref = jnp.tanh(x @ weight.T + bias)
    assert out.shape == (batch, width)
    assert jnp.allclose(out, ref, atol=1e-5, rtol=1e-5)

    # --- Fused multi-step trajectory (weight stays resident in the kernel). ---
    step4 = make_step_layer(weight, bias, num_steps=4)
    out4 = jax.block_until_ready(step4(x))
    ref4 = x
    for _ in range(4):
        ref4 = jnp.tanh(ref4 @ weight.T + bias)
    assert jnp.allclose(out4, ref4, atol=1e-5, rtol=1e-5)

    print("KERNEL_OK")
</pallas_src>

<mosaic_0001>
module attributes {stable_mosaic.version = 11 : i64} {
  func.func @kernel(%arg0: i32, %arg1: memref<8x128xf32, #tpu.memory_space<vmem>>, %arg2: memref<128x128xf32, #tpu.memory_space<vmem>>, %arg3: memref<1x128xf32, #tpu.memory_space<vmem>>, %arg4: memref<8x128xf32, #tpu.memory_space<vmem>>) attributes {dimension_semantics = [#tpu.dimension_semantics<parallel>], iteration_bounds = array<i64: 1>, scalar_prefetch = 0 : i64, scratch_operands = 0 : i64, tpu.core_type = #tpu.core_type<tc>, window_params = [{transform_indices = @transform_0, window_bounds = array<i64: 8, 128>}, {pipeline_mode = #tpu.pipeline_mode<synchronous>, transform_indices = @transform_1, window_bounds = array<i64: 128, 128>}, {pipeline_mode = #tpu.pipeline_mode<synchronous>, transform_indices = @transform_2, window_bounds = array<i64: 1, 128>}, {transform_indices = @transform_3, window_bounds = array<i64: 8, 128>}]} {
    %c0 = arith.constant 0 : index
    %c0_0 = arith.constant 0 : index
    %0 = vector.load %arg2[%c0, %c0_0] : memref<128x128xf32, #tpu.memory_space<vmem>>, vector<128x128xf32>
    %c0_1 = arith.constant 0 : index
    %c0_2 = arith.constant 0 : index
    %1 = vector.load %arg3[%c0_1, %c0_2] : memref<1x128xf32, #tpu.memory_space<vmem>>, vector<1x128xf32>
    %2 = vector.shape_cast %1 : vector<1x128xf32> to vector<1x128xf32>
    %3 = vector.broadcast %2 : vector<1x128xf32> to vector<8x128xf32>
    %c0_3 = arith.constant 0 : index
    %c0_4 = arith.constant 0 : index
    %4 = vector.load %arg1[%c0_3, %c0_4] : memref<8x128xf32, #tpu.memory_space<vmem>>, vector<8x128xf32>
    %cst = arith.constant dense<0.000000e+00> : vector<8x128xf32>
    %5 = tpu.matmul %4, %0, %cst {dimension_numbers = #tpu.dot_dimension_numbers<[1], [0], [0], [1], [0, 0, 1, 1], [], []>} : vector<8x128xf32>, vector<128x128xf32>, vector<8x128xf32> -> vector<8x128xf32>
    %6 = arith.addf %5, %3 : vector<8x128xf32>
    %7 = math.tanh %6 : vector<8x128xf32>
    %c0_5 = arith.constant 0 : index
    %c0_6 = arith.constant 0 : index
    %8 = vector.load %arg4[%c0_5, %c0_6] : memref<8x128xf32, #tpu.memory_space<vmem>>, vector<8x128xf32>
    tpu.vector_store %arg4[%c0_5, %c0_6], %7 {strides = array<i32>} : memref<8x128xf32, #tpu.memory_space<vmem>>, vector<8x128xf32>,
    return
  }
  func.func @transform_0(%arg0: i32) -> (i32, i32) {
    %c0_i32 = arith.constant 0 : i32
    %c0_i32_0 = arith.constant 0 : i32
    return %arg0, %c0_i32 : i32, i32
  }
  func.func @transform_1(%arg0: i32) -> (i32, i32) {
    %c0_i32 = arith.constant 0 : i32
    %c0_i32_0 = arith.constant 0 : i32
    %c0_i32_1 = arith.constant 0 : i32
    return %c0_i32, %c0_i32_0 : i32, i32
  }
  func.func @transform_2(%arg0: i32) -> (i32, i32) {
    %c0_i32 = arith.constant 0 : i32
    %c0_i32_0 = arith.constant 0 : i32
    %c0_i32_1 = arith.constant 0 : i32
    return %c0_i32, %c0_i32_0 : i32, i32
  }
  func.func @transform_3(%arg0: i32) -> (i32, i32) {
    %c0_i32 = arith.constant 0 : i32
    %c0_i32_0 = arith.constant 0 : i32
    return %arg0, %c0_i32 : i32, i32
  }
}

</mosaic_0001>

<bundles_post_ra>
// kernel: apply.1
= control target key start
LH: loop header
LB: loop body
LE: loop exit
PB: predicated region body
PF: predicated region fallthrough
CT: control target
= control target key end

     0   :  { %8 = vsyncpa [#allocation3], 0  ;;  %s186_s0 = inlined_call_operand.vmem [shape: f32[8,128], index: 0, kind: input, shape index: {}]   ;;  %s187_s1 = inlined_call_operand.hbm [shape: f32[128,128], index: 1, kind: input, shape index: {}]   ;;  %s188_s2 = inlined_call_operand.vmem [shape: f32[1,128], index: 2, kind: input, shape index: {}]   ;;  %s189_s3 = inlined_call_operand.hbm [shape: f32[8,128], index: 3, kind: output, shape index: {}]  }
   0x1   :  { %9 = vsyncpa [#allocation4], 0  ;;  %s16_s14 = sshll.u32 %s187_s1, 4  ;;  %s150_s15 = smov [#allocation2]   ;;  %s17_s14 = int_to_ptr.hbm [resolvable:$true] %s16_s14 }
   0x2   :  { %s18_s16 = sshll.u32 %s150_s15, 4  ;;  %s151_s17 = smov 128   ;;  %s19_s16 = int_to_ptr.vmem [resolvable:$true] %s18_s16 }
   0x3   :  { %s152_s18 = smov 8  }
   0x4   :  { %24 = dma.hbm_to_vmem [thread:$0]  %s17_s14, 2048, %s19_s16, [#allocation3], %s151_s17, %s151_s17, %s152_s18  }
   0x5   :  { %146 = dma.done.wait [#allocation3], 2048  }
   0x6   :  { %147 = vsyncadd [#allocation3], 4294965248  ;;  %v46_v0 = vld [vmem:[#allocation2 + $0x78] sm:$0xff]  ;;  %v45_v1 = vld [vmem:[#allocation2 + $0x70] sm:$0xff]  ;;  %s153_s22 = smov [#allocation5]   ;;  %s81_s26 = sshll.u32 %s189_s3, 4  ;;  %s82_s26 = int_to_ptr.hbm [resolvable:$true] %s81_s26 }
   0x7   :  { %52 = vmatpush.msra.mxu0 %v46_v0  ;;  %v44_v2 = vld [vmem:[#allocation2 + $0x68] sm:$0xff]  ;;  %v43_v3 = vld [vmem:[#allocation2 + $0x60] sm:$0xff]  ;;  %v42_v4 = vld [vmem:[#allocation2 + $0x58] sm:$0xff]  ;;  %s79_s23 = sshll.u32 %s153_s22, 4  ;;  %s80_s23 = int_to_ptr.vmem [resolvable:$true] %s79_s23 }
   0x8   :  { %v41_v5 = vld [vmem:[#allocation2 + $0x50] sm:$0xff]  ;;  %v40_v6 = vld [vmem:[#allocation2 + $0x48] sm:$0xff]  ;;  %v39_v7 = vld [vmem:[#allocation2 + $0x40] sm:$0xff] }
   0x9   :  { %53 = vmatpush.msra.mxu0 %v45_v1  ;;  %v38_v8 = vld [vmem:[#allocation2 + $0x38] sm:$0xff]  ;;  %v37_v9 = vld [vmem:[#allocation2 + $0x30] sm:$0xff]  ;;  %v36_v10 = vld [vmem:[#allocation2 + $0x28] sm:$0xff] }
   0xa   :  { %v35_v11 = vld [vmem:[#allocation2 + $0x20] sm:$0xff]  ;;  %v34_v12 = vld [vmem:[#allocation2 + $0x18] sm:$0xff]  ;;  %v33_v13 = vld [vmem:[#allocation2 + $0x10] sm:$0xff] }
   0xb   :  { %54 = vmatpush.msra.mxu0 %v44_v2  ;;  %v32_v14 = vld [vmem:[#allocation2 + $0x8] sm:$0xff]  ;;  %v31_v15 = vld [vmem:[#allocation2] sm:$0xff] }
   0xc   :  { %v51_v16 = vld [vmem:[%s186_s0] sm:$0xff] }
   0xd   :  { %55 = vmatpush.msra.mxu0 %v43_v3  ;;  %v95_v17 = vld [vmem:[%s188_s2] ss:$0 sm:$0xff] }
   0xf   :  { %56 = vmatpush.msra.mxu0 %v42_v4 }
  0x11   :  { %57 = vmatpush.msra.mxu0 %v41_v5 }
  0x13   :  { %58 = vmatpush.msra.mxu0 %v40_v6 }
  0x15   :  { %59 = vmatpush.msra.mxu0 %v39_v7 }
  0x17   :  { %60 = vmatpush.msra.mxu0 %v38_v8 }
  0x19   :  { %61 = vmatpush.msra.mxu0 %v37_v9 }
  0x1b   :  { %62 = vmatpush.msra.mxu0 %v36_v10 }
  0x1d   :  { %63 = vmatpush.msra.mxu0 %v35_v11 }
  0x1f   :  { %64 = vmatpush.msra.mxu0 %v34_v12 }
  0x21   :  { %65 = vmatpush.msra.mxu0 %v33_v13 }
  0x23   :  { %66 = vmatpush.msra.mxu0 %v32_v14 }
  0x25   :  { %67 = vmatpush.msra.mxu0 %v31_v15 }
  0x26   :  { %68 = vmatmul.f32.vlgmr.msra.gmra.mxu0 %v51_v16 }
  0xa3   :  { %v69_v18 = vpop.f32.mrf.mxu0 }
  0xa4   :  { %v70_v19 = vadd.f32 %v95_v17, %v69_v18 }
  0xa6   :  { %96 = vtanh.f32 %v70_v19 }
  0xac   :  { %v97_v20 = vpop.eup %96 }
  0xad   :  { %73 = vst [vmem:[#allocation5] sm:$0xff] %v97_v20 }
  0xae   :  { %84 = dma.vmem_to_hbm [thread:$0]  %s80_s23, 128, %s82_s26, [#allocation4]  }
  0xaf   :  { %148 = dma.done.wait [#allocation4], 128  }
  0xb0   :  { %149 = vsyncadd [#allocation4], 4294967168 }
  0xb1   :  { %89 = vsyncpa [#allocation3], 1 }
  0xb2   :  { %90 = vsyncpa [#allocation4], 1 }

</bundles_post_ra>
